<compile_context>
chip_gen: v7x
topology: tpu7x:2x2x1
jax: 0.10.0
libtpu: 0.0.40
codegen_flags: <defaults>
</compile_context>

<pallas_src>
import functools

import jax
import jax.numpy as jnp
from jax.experimental import pallas as pl
from jax.experimental.pallas import tpu as pltpu

_LANES = 128
_SUBLANES = 8


def _round_up(x: int, m: int) -> int:
    return ((x + m - 1) // m) * m


def _wsl1_kernel(pred_ref, targ_ref, w_ref, out_ref, acc_ref, *,
                 beta: float, valid_rows: int, block_rows: int,
                 blocks_per_core: int, maybe_partial: bool):
    """One grid step: fold a (block_rows, 128) tile into a (8, 128) accumulator."""
    c = pl.program_id(0)          # TensorCore split axis ("parallel")
    i = pl.program_id(1)          # sequential reduction axis ("arbitrary")

    @pl.when(i == 0)
    def _():
        acc_ref[...] = jnp.zeros_like(acc_ref)

    p = pred_ref[...].astype(jnp.float32)      # upcast in-kernel (native dtype in HBM)
    t = targ_ref[...].astype(jnp.float32)
    diff = jnp.abs(p - t)
    if beta < 1e-5:                            # static Python branch (module semantics)
        loss = diff
    else:
        loss = jnp.where(diff < beta, diff * diff * (0.25 / beta),
                         diff - 0.5 * beta)

    groups = block_rows // _SUBLANES           # sublane fold: (tr,128)->(8,128)

    if not maybe_partial:
        # every tile is full and every logical block is valid: no masking anywhere
        acc_ref[...] += loss.reshape(groups, _SUBLANES, _LANES).sum(axis=0)
    else:
        row_start = (c * blocks_per_core + i) * block_rows   # unclamped logical offset
        is_full = row_start + block_rows <= valid_rows

        @pl.when(is_full)
        def _():
            acc_ref[...] += loss.reshape(groups, _SUBLANES, _LANES).sum(axis=0)

        @pl.when(jnp.logical_not(is_full))
        def _():
            rows = row_start + jax.lax.broadcasted_iota(jnp.int32, loss.shape, 0)
            masked = jnp.where(rows < valid_rows, loss, 0.0)   # select: garbage discarded
            acc_ref[...] += masked.reshape(groups, _SUBLANES, _LANES).sum(axis=0)

    @pl.when(i == pl.num_programs(1) - 1)
    def _():
        # weights are per-lane only, so applying them after the row reduction
        # is exact up to fp rounding; single cross-lane reduce per core.
        out_ref[0, 0] = jnp.sum(acc_ref[...] * w_ref[...])


def weighted_smooth_l1_loss(pred, target, target_weights, *, beta: float = 0.0,
                            block_rows: int = 8192):
    """pred/target: (..., C); target_weights: (C,). Returns scalar f32 loss."""
    C = pred.shape[-1]
    assert target.shape == pred.shape
    assert target_weights.shape == (C,)
    assert _LANES % C == 0, "channel count must divide the 128-lane width"

    p_flat = pred.reshape(-1)                  # natural interleaved order, native dtype
    t_flat = target.reshape(-1)
    n = p_flat.shape[0]
    w32 = target_weights.astype(jnp.float32)

    rows = n // _LANES                         # full 128-wide rows -> kernel
    tail = n - rows * _LANES                   # <128 leftover elems -> plain JAX

    total = jnp.float32(0.0)

    if rows > 0:
        tr = min(_round_up(block_rows, 32), _round_up(rows, 32))
        nblocks = pl.cdiv(rows, tr)
        ncores = 2 if nblocks >= 2 else 1      # 2-TC split on v7x; harmless elsewhere
        hb = pl.cdiv(nblocks, ncores)          # row-blocks per core

        if tail == 0:
            p_main = p_flat.reshape(rows, _LANES)           # free row-major reshape
            t_main = t_flat.reshape(rows, _LANES)
        else:
            # TODO(synk): this prefix slice may cost one extra HBM pass; arrange
            #             n % 128 == 0 upstream for the zero-copy path.
            p_main = p_flat[: rows * _LANES].reshape(rows, _LANES)
            t_main = t_flat[: rows * _LANES].reshape(rows, _LANES)

        # lane-periodic weights, pre-tiled to a full (8,128) vreg (stays resident)
        w_tile = jnp.tile(jnp.tile(w32, _LANES // C).reshape(1, _LANES),
                          (_SUBLANES, 1))

        maybe_partial = (rows % tr != 0) or (nblocks % ncores != 0)

        def tile_map(c, i):
            b = c * hb + i
            if ncores * hb > nblocks:          # odd split: clamp the one OOB block
                b = jnp.minimum(b, nblocks - 1)
            return (b, 0)

        kernel = functools.partial(
            _wsl1_kernel, beta=float(beta), valid_rows=rows, block_rows=tr,
            blocks_per_core=hb, maybe_partial=maybe_partial)

        out = pl.pallas_call(
            kernel,
            out_shape=jax.ShapeDtypeStruct((ncores, 1), jnp.float32),
            grid_spec=pltpu.PrefetchScalarGridSpec(
                num_scalar_prefetch=0,
                grid=(ncores, hb),
                in_specs=[
                    pl.BlockSpec((tr, _LANES), tile_map),              # pred tile
                    pl.BlockSpec((tr, _LANES), tile_map),              # target tile
                    pl.BlockSpec((_SUBLANES, _LANES), lambda c, i: (0, 0)),  # weights
                ],
                out_specs=pl.BlockSpec((1, 1), lambda c, i: (c, 0),
                                       memory_space=pltpu.SMEM),
                scratch_shapes=[pltpu.VMEM((_SUBLANES, _LANES), jnp.float32)],
            ),
            compiler_params=pltpu.CompilerParams(
                dimension_semantics=("parallel", "arbitrary"),
                vmem_limit_bytes=48 * 1024 * 1024),
        )(p_main, t_main, w_tile)
        total = total + jnp.sum(out)           # sum the per-core partials

    if tail > 0:
        # tiny (<128 element) ragged lane tail: plain JAX, negligible cost
        p_tail = p_flat[rows * _LANES:].astype(jnp.float32)
        t_tail = t_flat[rows * _LANES:].astype(jnp.float32)
        w_tail = jnp.tile(w32, tail // C)
        d = jnp.abs(p_tail - t_tail)
        if beta < 1e-5:
            l = d
        else:
            l = jnp.where(d < beta, d * d * (0.25 / beta), d - 0.5 * beta)
        total = total + jnp.sum(l * w_tail)

    return total


def reference_loss(pred, target, target_weights, beta=0.0):
    d = jnp.abs(pred.astype(jnp.float32) - target.astype(jnp.float32))
    if beta < 1e-5:
        loss = d
    else:
        loss = jnp.where(d < beta, jnp.square(0.5 * d) / beta, d - 0.5 * beta)
    return jnp.sum(loss * target_weights.astype(jnp.float32))


if __name__ == "__main__":
    # Module __init__: beta=0.0, target_weights=[0.3, 0.7]
    beta = 0.0
    target_weights = jnp.array([0.3, 0.7], dtype=jnp.float32)

    key = jax.random.PRNGKey(0)
    k1, k2 = jax.random.split(key)
    pred = jax.random.normal(k1, (2, 200, 2), dtype=jnp.float32)
    target = jax.random.normal(k2, (2, 200, 2), dtype=jnp.float32)

    out = jax.block_until_ready(
        weighted_smooth_l1_loss(pred, target, target_weights, beta=beta))
    ref = reference_loss(pred, target, target_weights, beta=beta)
    assert jnp.allclose(out, ref, rtol=1e-5, atol=1e-3), (out, ref)

    # smooth (beta > 0) branch of the kernel
    out_b = jax.block_until_ready(
        weighted_smooth_l1_loss(pred, target, target_weights, beta=1.0))
    ref_b = reference_loss(pred, target, target_weights, beta=1.0)
    assert jnp.allclose(out_b, ref_b, rtol=1e-5, atol=1e-3), (out_b, ref_b)

    # multi-block path: 2-core split with odd block count + ragged last tile + lane tail
    k3, k4 = jax.random.split(k2)
    pred2 = jax.random.normal(k3, (4, 3000, 2), dtype=jnp.float32)
    target2 = jax.random.normal(k4, (4, 3000, 2), dtype=jnp.float32)
    out2 = jax.block_until_ready(
        weighted_smooth_l1_loss(pred2, target2, target_weights, beta=beta,
                                block_rows=64))
    ref2 = reference_loss(pred2, target2, target_weights, beta=beta)
    assert jnp.allclose(out2, ref2, rtol=1e-5, atol=1e-3), (out2, ref2)

    # clean path: tail==0, even block count -> unmasked 2-core split, zero-copy view
    k5, k6 = jax.random.split(k4)
    pred3 = jax.random.normal(k5, (64, 64, 2), dtype=jnp.float32)
    target3 = jax.random.normal(k6, (64, 64, 2), dtype=jnp.float32)
    out3 = jax.block_until_ready(
        weighted_smooth_l1_loss(pred3, target3, target_weights, beta=beta,
                                block_rows=32))
    ref3 = reference_loss(pred3, target3, target_weights, beta=beta)
    assert jnp.allclose(out3, ref3, rtol=1e-5, atol=1e-3), (out3, ref3)

    print("KERNEL_OK")
</pallas_src>

<mosaic_0001>
module attributes {stable_mosaic.version = 11 : i64} {
  func.func @_wsl1_kernel(%arg0: i32, %arg1: i32, %arg2: memref<32x128xf32, #tpu.memory_space<vmem>>, %arg3: memref<32x128xf32, #tpu.memory_space<vmem>>, %arg4: memref<8x128xf32, #tpu.memory_space<vmem>>, %arg5: memref<1x1xf32, #tpu.memory_space<smem>>, %arg6: memref<8x128xf32, #tpu.memory_space<vmem>>) attributes {dimension_semantics = [#tpu.dimension_semantics<parallel>, #tpu.dimension_semantics<arbitrary>], iteration_bounds = array<i64: 1, 1>, scalar_prefetch = 0 : i64, scratch_operands = 1 : i64, tpu.core_type = #tpu.core_type<tc>, window_params = [{transform_indices = @transform_0, window_bounds = array<i64: 32, 128>}, {transform_indices = @transform_1, window_bounds = array<i64: 32, 128>}, {pipeline_mode = #tpu.pipeline_mode<synchronous>, transform_indices = @transform_2, window_bounds = array<i64: 8, 128>}, {transform_indices = @transform_3, window_bounds = array<i64: 1, 1>}]} {
    %c0_i32 = arith.constant 0 : i32
    %0 = arith.cmpi eq, %arg1, %c0_i32 : i32
    %1 = arith.extui %0 : i1 to i32
    %c0_i32_0 = arith.constant 0 : i32
    %2 = arith.cmpi ne, %1, %c0_i32_0 : i32
    scf.if %2 {
      %cst = arith.constant 0.000000e+00 : f32
      %20 = vector.broadcast %cst : f32 to vector<8x128xf32>
      %c0_9 = arith.constant 0 : index
      %c0_10 = arith.constant 0 : index
      %21 = vector.load %arg6[%c0_9, %c0_10] : memref<8x128xf32, #tpu.memory_space<vmem>>, vector<8x128xf32>
      tpu.vector_store %arg6[%c0_9, %c0_10], %20 {strides = array<i32>} : memref<8x128xf32, #tpu.memory_space<vmem>>, vector<8x128xf32>,
    } else {
    }
    %c0 = arith.constant 0 : index
    %c0_1 = arith.constant 0 : index
    %3 = vector.load %arg2[%c0, %c0_1] : memref<32x128xf32, #tpu.memory_space<vmem>>, vector<32x128xf32>
    %c0_2 = arith.constant 0 : index
    %c0_3 = arith.constant 0 : index
    %4 = vector.load %arg3[%c0_2, %c0_3] : memref<32x128xf32, #tpu.memory_space<vmem>>, vector<32x128xf32>
    %5 = arith.subf %3, %4 : vector<32x128xf32>
    %6 = math.absf %5 : vector<32x128xf32>
    %c1_i32 = arith.constant 1 : i32
    %7 = arith.muli %arg0, %c1_i32 : i32
    %8 = arith.addi %7, %arg1 : i32
    %c32_i32 = arith.constant 32 : i32
    %9 = arith.muli %8, %c32_i32 : i32
    %c32_i32_4 = arith.constant 32 : i32
    %10 = arith.addi %9, %c32_i32_4 : i32
    %c6_i32 = arith.constant 6 : i32
    %11 = arith.cmpi sle, %10, %c6_i32 : i32
    %12 = arith.extui %11 : i1 to i32
    %c0_i32_5 = arith.constant 0 : i32
    %13 = arith.cmpi ne, %12, %c0_i32_5 : i32
    scf.if %13 {
      %c0_9 = arith.constant 0 : index
      %c0_10 = arith.constant 0 : index
      %20 = vector.load %arg6[%c0_9, %c0_10] : memref<8x128xf32, #tpu.memory_space<vmem>>, vector<8x128xf32>
      %21 = vector.shape_cast %6 : vector<32x128xf32> to vector<4x8x128xf32>
      %cst = arith.constant dense<0.000000e+00> : vector<8x128xf32>
      %22 = vector.multi_reduction <add>, %21, %cst [0] : vector<4x8x128xf32> to vector<8x128xf32>
      %23 = arith.addf %20, %22 : vector<8x128xf32>
      %c0_11 = arith.constant 0 : index
      %c0_12 = arith.constant 0 : index
      %24 = vector.load %arg6[%c0_11, %c0_12] : memref<8x128xf32, #tpu.memory_space<vmem>>, vector<8x128xf32>
      tpu.vector_store %arg6[%c0_11, %c0_12], %23 {strides = array<i32>} : memref<8x128xf32, #tpu.memory_space<vmem>>, vector<8x128xf32>,
    } else {
    }
    %true = arith.constant true
    %14 = arith.xori %11, %true : i1
    %15 = arith.extui %14 : i1 to i32
    %c0_i32_6 = arith.constant 0 : i32
    %16 = arith.cmpi ne, %15, %c0_i32_6 : i32
    scf.if %16 {
      %20 = tpu.iota {dimensions = array<i32: 0>} : vector<32x128xi32>
      %21 = vector.broadcast %9 : i32 to vector<32x128xi32>
      %22 = arith.addi %21, %20 : vector<32x128xi32>
      %c6_i32_9 = arith.constant 6 : i32
      %23 = vector.broadcast %c6_i32_9 : i32 to vector<32x128xi32>
      %24 = arith.cmpi slt, %22, %23 : vector<32x128xi32>
      %cst = arith.constant 0.000000e+00 : f32
      %25 = vector.broadcast %cst : f32 to vector<32x128xf32>
      %26 = arith.select %24, %6, %25 : vector<32x128xi1>, vector<32x128xf32>
      %c0_10 = arith.constant 0 : index
      %c0_11 = arith.constant 0 : index
      %27 = vector.load %arg6[%c0_10, %c0_11] : memref<8x128xf32, #tpu.memory_space<vmem>>, vector<8x128xf32>
      %28 = vector.shape_cast %26 : vector<32x128xf32> to vector<4x8x128xf32>
      %cst_12 = arith.constant dense<0.000000e+00> : vector<8x128xf32>
      %29 = vector.multi_reduction <add>, %28, %cst_12 [0] : vector<4x8x128xf32> to vector<8x128xf32>
      %30 = arith.addf %27, %29 : vector<8x128xf32>
      %c0_13 = arith.constant 0 : index
      %c0_14 = arith.constant 0 : index
      %31 = vector.load %arg6[%c0_13, %c0_14] : memref<8x128xf32, #tpu.memory_space<vmem>>, vector<8x128xf32>
      tpu.vector_store %arg6[%c0_13, %c0_14], %30 {strides = array<i32>} : memref<8x128xf32, #tpu.memory_space<vmem>>, vector<8x128xf32>,
    } else {
    }
    %c0_i32_7 = arith.constant 0 : i32
    %17 = arith.cmpi eq, %arg1, %c0_i32_7 : i32
    %18 = arith.extui %17 : i1 to i32
    %c0_i32_8 = arith.constant 0 : i32
    %19 = arith.cmpi ne, %18, %c0_i32_8 : i32
    scf.if %19 {
      %c0_9 = arith.constant 0 : index
      %c0_10 = arith.constant 0 : index
      %20 = vector.load %arg6[%c0_9, %c0_10] : memref<8x128xf32, #tpu.memory_space<vmem>>, vector<8x128xf32>
      %c0_11 = arith.constant 0 : index
      %c0_12 = arith.constant 0 : index
      %21 = vector.load %arg4[%c0_11, %c0_12] : memref<8x128xf32, #tpu.memory_space<vmem>>, vector<8x128xf32>
      %22 = arith.mulf %20, %21 : vector<8x128xf32>
      %23 = vector.shape_cast %22 : vector<8x128xf32> to vector<1x8x128xf32>
      %cst = arith.constant dense<0.000000e+00> : vector<1xf32>
      %24 = vector.multi_reduction <add>, %23, %cst [1, 2] : vector<1x8x128xf32> to vector<1xf32>
      %25 = vector.shape_cast %24 : vector<1xf32> to vector<1x1x1xf32>
      %26 = vector.extract %25[0, 0, 0] : f32 from vector<1x1x1xf32>
      %c0_13 = arith.constant 0 : index
      %c0_14 = arith.constant 0 : index
      %27 = memref.load %arg5[%c0_13, %c0_14] : memref<1x1xf32, #tpu.memory_space<smem>>
      memref.store %26, %arg5[%c0_13, %c0_14] : memref<1x1xf32, #tpu.memory_space<smem>>
    } else {
    }
    return
  }
  func.func @transform_0(%arg0: i32, %arg1: i32) -> (i32, i32) {
    %c1_i32 = arith.constant 1 : i32
    %0 = arith.muli %arg0, %c1_i32 : i32
    %1 = arith.addi %0, %arg1 : i32
    %c0_i32 = arith.constant 0 : i32
    %c0_i32_0 = arith.constant 0 : i32
    return %1, %c0_i32 : i32, i32
  }
  func.func @transform_1(%arg0: i32, %arg1: i32) -> (i32, i32) {
    %c1_i32 = arith.constant 1 : i32
    %0 = arith.muli %arg0, %c1_i32 : i32
    %1 = arith.addi %0, %arg1 : i32
    %c0_i32 = arith.constant 0 : i32
    %c0_i32_0 = arith.constant 0 : i32
    return %1, %c0_i32 : i32, i32
  }
  func.func @transform_2(%arg0: i32, %arg1: i32) -> (i32, i32) {
    %c0_i32 = arith.constant 0 : i32
    %c0_i32_0 = arith.constant 0 : i32
    %c0_i32_1 = arith.constant 0 : i32
    return %c0_i32, %c0_i32_0 : i32, i32
  }
  func.func @transform_3(%arg0: i32, %arg1: i32) -> (i32, i32) {
    %c0_i32 = arith.constant 0 : i32
    %c0_i32_0 = arith.constant 0 : i32
    return %arg0, %c0_i32 : i32, i32
  }
}

</mosaic_0001>

<bundles_post_ra>
// kernel: tpu_custom_call.1
= control target key start
LH: loop header
LB: loop body
LE: loop exit
PB: predicated region body
PF: predicated region fallthrough
CT: control target
= control target key end

     0   :  { %8 = vsyncpa [#allocation4], 0  ;;  %s336_s0 = inlined_call_operand.hbm [shape: f32[6,128], index: 0, kind: input, shape index: {}]   ;;  %s337_s1 = inlined_call_operand.hbm [shape: f32[6,128], index: 1, kind: input, shape index: {}]   ;;  %s338_s2 = inlined_call_operand.hbm [shape: f32[8,128], index: 2, kind: input, shape index: {}]   ;;  %s339_s3 = inlined_call_operand.hbm [shape: f32[1,1], index: 3, kind: output, shape index: {}]  }
   0x1   :  { %9 = vsyncpa [#allocation7], 0 }
   0x2   :  { %10 = vsyncpa [#allocation5], 0 }
   0x3   :  { %19 = vsyncadd [#allocation4], 384  ;;  %s262_s12 = smov [#allocation3]   ;;  %s180_s16 = scalar_lea.hbm %s336_s0, 128 }
   0x4   :  { %s24_s13 = sshll.u32 %s262_s12, 4  ;;  %p181_p0 = scmp.ne.s32.totalorder %s336_s0, %s180_s16  ;;  %s25_s13 = int_to_ptr.vmem [resolvable:$true] %s24_s13 }
   0x5   :  { %p184_p1 = scmp.lt.u32.totalorder %s180_s16, %s336_s0 }
   0x7   :  { %p186_p2 = pnand %p184_p1, %p181_p0 }
   0x9   :  { %189 = shalt.err (!%p186_p2)
}
   0xa   :  { %s190_s21 = scalar_lea.vmem %s25_s13, 128  ;;  %s194_s22 = scalar_lea.vmem %s25_s13, 512 }
   0xb   :  { %p191_p3 = scmp.ne.s32.totalorder %s25_s13, %s190_s21  ;;  %p195_p4 = scmp.lt.s32.totalorder %s25_s13, %s25_s13 }
   0xc   :  { %p196_p5 = scmp.lt.s32.totalorder %s194_s22, %s190_s21 }
   0xe   :  { %p197_p6 = por %p196_p5, %p195_p4 }
  0x10   :  { %p198_p7 = pnand %p197_p6, %p191_p3 }
  0x12   :  { %201 = shalt.err (!%p198_p7)
}
  0x13   :  { %s263_s23 = smov 128   ;;  %s264_s24 = smov 8  }
  0x14   :  { %30 = dma.hbm_to_vmem [thread:$0]  %s336_s0, 128, %s25_s13, [#allocation4], %s263_s23, %s263_s23, %s264_s24  }
  0x15   :  { %39 = vsyncadd [#allocation7], 384  ;;  %s265_s27 = smov [#allocation6]   ;;  %s266_s29 = smov [#allocation8]  }
  0x16   :  { %s44_s28 = sshll.u32 %s265_s27, 4  ;;  %s57_s30 = sshll.u32 %s266_s29, 4  ;;  %s45_s28 = int_to_ptr.vmem [resolvable:$true] %s44_s28  ;;  %s58_s30 = int_to_ptr.vmem [resolvable:$true] %s57_s30 }
  0x17   :  { %s202_s6 = scalar_lea.hbm %s337_s1, 128 }
  0x18   :  { %p203_p8 = scmp.ne.s32.totalorder %s337_s1, %s202_s6  ;;  %p206_p9 = scmp.lt.u32.totalorder %s202_s6, %s337_s1 }
  0x1a   :  { %p208_p10 = pnand %p206_p9, %p203_p8 }
  0x1c   :  { %211 = shalt.err (!%p208_p10)
}
  0x1d   :  { %s212_s0 = scalar_lea.vmem %s45_s28, 128  ;;  %s216_s11 = scalar_lea.vmem %s45_s28, 512 }
  0x1e   :  { %p213_p11 = scmp.ne.s32.totalorder %s45_s28, %s212_s0  ;;  %p217_p12 = scmp.lt.s32.totalorder %s45_s28, %s45_s28 }
  0x1f   :  { %p218_p13 = scmp.lt.s32.totalorder %s216_s11, %s212_s0 }
  0x21   :  { %p219_p0 = por %p218_p13, %p217_p12 }
  0x23   :  { %p220_p1 = pnand %p219_p0, %p213_p11 }
  0x25   :  { %223 = shalt.err (!%p220_p1)
}
  0x26   :  { %50 = dma.hbm_to_vmem [thread:$0]  %s337_s1, 128, %s45_s28, [#allocation7], %s263_s23, %s263_s23, %s264_s24  }
  0x27   :  { %s224_s16 = scalar_lea.hbm %s338_s2, 128 }
  0x28   :  { %p225_p2 = scmp.ne.s32.totalorder %s338_s2, %s224_s16  ;;  %p228_p3 = scmp.lt.u32.totalorder %s224_s16, %s338_s2 }
  0x2a   :  { %p230_p4 = pnand %p228_p3, %p225_p2 }
  0x2c   :  { %233 = shalt.err (!%p230_p4)
}
  0x2d   :  { %s234_s21 = scalar_lea.vmem %s58_s30, 128  ;;  %p239_p6 = scmp.lt.s32.totalorder %s58_s30, %s58_s30 }
  0x2e   :  { %p235_p5 = scmp.ne.s32.totalorder %s58_s30, %s234_s21  ;;  %p240_p7 = scmp.lt.s32.totalorder %s234_s21, %s234_s21 }
  0x30   :  { %p241_p8 = por %p240_p7, %p239_p6 }
  0x32   :  { %p242_p9 = pnand %p241_p8, %p235_p5 }
  0x34   :  { %245 = shalt.err (!%p242_p9)
}
  0x35   :  { %60 = dma.hbm_to_vmem [thread:$0]  %s338_s2, 128, %s58_s30, [#allocation7]  }
  0x36   :  { %256 = dma.done.wait [#allocation4], 512  }
  0x37   :  { %257 = vsyncadd [#allocation4], 4294966784 }
  0x38   :  { %258 = dma.done.wait [#allocation7], 640  }
  0x39   :  { %259 = vsyncadd [#allocation7], 4294966656  ;;  %v116_v0 = vlaneseq  ;;  %v83_v2 = vld [vmem:[#allocation3] sm:$0xff]  ;;  %s246_s25 = scalar_lea.hbm %s339_s3, 16 }
  0x3a   :  { %v87_v3 = vld [vmem:[#allocation6] sm:$0xff]  ;;  %p247_p10 = scmp.ne.s32.totalorder %s339_s3, %s246_s25  ;;  %p250_p11 = scmp.lt.u32.totalorder %s246_s25, %s339_s3 }
  0x3b   :  { %v117_v1 = vshrl.u32 %v116_v0, 7  ;;  %v91_v4 = vsub.f32 %v83_v2, %v87_v3  ;;  %v144_v6 = vld [vmem:[#allocation8] sm:$0xff] }
  0x3c   :  { %p252_p12 = pnand %p250_p11, %p247_p10 }
  0x3d   :  { %vm126_vm0 = vcmp.lt.s32.totalorder %v117_v1, 6  ;;  %v95_v5 = vand.u32 2147483647, %v91_v4 }
  0x3f   :  { %v130_v7 = vsel %vm126_vm0, %v95_v5, 0.0 }
  0x40   :  { %v145_v8 = vmul.f32 %v144_v6, %v130_v7 }
  0x42   :  { %146 = vadd.xlane.f32.xlu0 %v145_v8 }
  0xcf   :  { %v147_v9 = vpop.xlane.xlu0 %146 }
  0xd0   :  { %v148_v10 = vrot.slane %v147_v9, 4 }
  0xd2   :  { %v149_v11 = vadd.f32 %v148_v10, %v147_v9 }
  0xd4   :  { %v150_v12 = vrot.slane %v149_v11, 2 }
  0xd6   :  { %v151_v13 = vadd.f32 %v150_v12, %v149_v11 }
  0xd8   :  { %v152_v14 = vrot.slane %v151_v13, 1 }
  0xda   :  { %v153_v15 = vadd.f32 %v152_v14, %v151_v13 }
  0xdc   :  { %172 = vpush %v153_v15 }
 0x10d   :  { %s173_s2 = spop %172 }
 0x10e   :  { %156 = sst [smem:[#allocation9]] %s173_s2 }
 0x10f   :  { %255 = shalt.err (!%p252_p12)
}
 0x110   :  { %s267_s30 = smov [#allocation9]  }
 0x111   :  { %164 = dma.smem_to_hbm %s267_s30, 16, %s339_s3, [#allocation5]  }
 0x112   :  { %260 = dma.done.wait [#allocation5], 16  }
 0x113   :  { %261 = vsyncadd [#allocation5], 4294967280 }
 0x114   :  { %168 = sfence }
 0x115   :  { %169 = vsyncpa [#allocation4], 1 }
 0x116   :  { %170 = vsyncpa [#allocation7], 1 }
 0x117   :  { %171 = vsyncpa [#allocation5], 1 }

</bundles_post_ra>
